<compile_context>
chip_gen: v7x
topology: tpu7x:2x2x1
jax: 0.10.0
libtpu: 0.0.40
codegen_flags: <defaults>
</compile_context>

<pallas_src>
import functools
import math

import jax
import jax.numpy as jnp
from jax.experimental import pallas as pl
from jax.experimental.pallas import tpu as pltpu

HIDDEN = 768  # self.hidden_size = 768 (fixed in VLNBertCMT.__init__)


# ----------------------------------------------------------------------------- kernels

def _pos_encoder_add_kernel(pos_ref, w_ref, b_ref, g_ref, beta_ref, emb_ref, out_ref):
    """out = embeds + LayerNorm(pos @ W + b)  (eps = 1e-12, biased variance).

    The K=3 contraction is expanded into three broadcast-FMAs on the VPU instead of an
    MXU matmul (a K=3 matmul would use ~2% of the systolic array).  Embeds arrive in
    their native dtype (bf16), are upcast for the add, and written back in-place dtype."""
    p = pos_ref[...]                       # (tile, 3)  f32
    w = w_ref[...]                         # (3, H)     f32
    x = (p[:, 0:1] * w[0:1, :]
         + p[:, 1:2] * w[1:2, :]
         + p[:, 2:3] * w[2:3, :]
         + b_ref[...])                     # (tile, H)  f32
    mu = jnp.mean(x, axis=-1, keepdims=True)
    xc = x - mu
    var = jnp.mean(xc * xc, axis=-1, keepdims=True)
    ln = xc * jax.lax.rsqrt(var + 1e-12) * g_ref[...] + beta_ref[...]
    out_ref[...] = (emb_ref[...].astype(jnp.float32) + ln).astype(out_ref.dtype)


def _history_mapper_kernel(x_ref, w1_ref, b1_ref, w2_ref, b2_ref, out_ref, *, n_sub):
    """out = (relu(x @ W1 + b1)) @ W2 + b2 — bf16 MXU inputs, f32 accumulation.

    The row tile is split into `n_sub` static sub-chunks (unrolled) so the MXU matmul of
    chunk j+1 can co-issue while the VPU runs the bias+ReLU+cast epilogue of chunk j.
    Epilogue math is kept in f32 (portable to v5e, which has no bf16 VALU)."""
    w1 = w1_ref[...]
    w2 = w2_ref[...]
    b1 = b1_ref[...]
    b2 = b2_ref[...]
    rows = x_ref.shape[0]
    chunk = rows // n_sub
    for j in range(n_sub):                                    # static → unrolled
        sl = pl.ds(j * chunk, chunk)
        h = jnp.dot(x_ref[sl, :], w1, preferred_element_type=jnp.float32) + b1
        h = jnp.maximum(h, 0.0).astype(jnp.bfloat16)
        out_ref[sl, :] = (jnp.dot(h, w2, preferred_element_type=jnp.float32)
                          + b2).astype(out_ref.dtype)


def _states_kernel(idx_ref, act_ref, am_ref, txt_ref, out_ref, *, txt_window):
    """states[b] = txt_embeds[b, idx[b]] * masked_mean(action_embeds[b, 1:]).

    Runs one batch element per grid step.  `idx_ref` holds the prefetched last-valid
    txt-token index; only a `txt_window`-row slab of txt_embeds containing that row is
    DMA'd (see the txt BlockSpec), and the exact row is selected here with a dynamic
    sublane slice.  `am_ref` is the full-length mask with a zeroed first column, so no
    sublane-crossing act[:, 1:, :] slice is needed."""
    b = pl.program_id(0)
    act = act_ref[...].astype(jnp.float32)                    # (1, L, H)
    am = am_ref[...]                                          # (1, L, 1) f32
    valid = jnp.sum(am, axis=1, keepdims=True)                # (1, 1, 1)
    # NOTE: a batch row with zero valid actions divides by 0 (Inf/NaN) — identical to
    # the torch reference; guard upstream if such rows can occur.
    hist_mean = jnp.sum(act * am, axis=1, keepdims=True) / valid   # (1, 1, H)
    row = idx_ref[b] % txt_window
    sel = txt_ref[:, pl.ds(row, 1), :].astype(jnp.float32)    # (1, 1, H)
    out_ref[...] = (sel * hist_mean).astype(out_ref.dtype)


# ----------------------------------------------------------------------------- wrappers

def position_encoder_add(position, embeds, params, max_tile=1024):
    """position: (..., 3) or list thereof, embeds: (..., H) or list thereof.

    Returns embeds + LayerNorm(Linear(position)).  When lists are given, all pairs are
    fused into ONE pallas_call (one launch, one weight DMA) — used to merge the tiny
    'action'-mode call (R = batch rows) with the 'observation'-mode call.  At tile=1024
    the double-buffered in/out streams are ~6 MB in bf16, well under the 32 MiB scoped
    VMEM default on v5e/v6e/v7x."""
    is_list = isinstance(position, (list, tuple))
    pos_list = list(position) if is_list else [position]
    emb_list = list(embeds) if is_list else [embeds]
    assert len(pos_list) == len(emb_list)
    out_dtype = emb_list[0].dtype
    assert all(e.dtype == out_dtype for e in emb_list)
    shapes = [e.shape for e in emb_list]
    rows = [math.prod(s[:-1]) for s in shapes]

    pos2d = [p.reshape(-1, 3) for p in pos_list]
    emb2d = [e.reshape(-1, HIDDEN) for e in emb_list]
    pos2d = pos2d[0] if len(pos2d) == 1 else jnp.concatenate(pos2d, axis=0)
    emb2d = emb2d[0] if len(emb2d) == 1 else jnp.concatenate(emb2d, axis=0)
    if pos2d.dtype != jnp.float32:
        pos2d = pos2d.astype(jnp.float32)          # tiny (R, 3) stream

    R = pos2d.shape[0]
    # Single full block when R fits one tile (block dims == full array dims is always
    # legal); otherwise a sublane-aligned tile with a Pallas-masked partial last block.
    tile = R if R <= max_tile else max_tile
    esz = jnp.dtype(out_dtype).itemsize

    out = pl.pallas_call(
        _pos_encoder_add_kernel,
        out_shape=jax.ShapeDtypeStruct((R, HIDDEN), out_dtype),
        grid=(pl.cdiv(R, tile),),
        in_specs=[
            pl.BlockSpec((tile, 3), lambda i: (i, 0)),          # positions (row-tiled)
            pl.BlockSpec((3, HIDDEN), lambda i: (0, 0)),        # weight   (resident)
            pl.BlockSpec((1, HIDDEN), lambda i: (0, 0)),        # bias     (resident)
            pl.BlockSpec((1, HIDDEN), lambda i: (0, 0)),        # LN gamma (resident)
            pl.BlockSpec((1, HIDDEN), lambda i: (0, 0)),        # LN beta  (resident)
            pl.BlockSpec((tile, HIDDEN), lambda i: (i, 0)),     # embeds (row-tiled, bf16)
        ],
        out_specs=pl.BlockSpec((tile, HIDDEN), lambda i: (i, 0)),
        compiler_params=pltpu.CompilerParams(dimension_semantics=("parallel",)),
        cost_estimate=pl.CostEstimate(
            flops=int(R) * 16 * HIDDEN,
            transcendentals=int(R),
            bytes_accessed=int(R) * (3 * 4 + 2 * HIDDEN * esz) + 5 * HIDDEN * 4,
        ),
    )(pos2d, params["pos_w"], params["pos_b"], params["ln_g"], params["ln_b"], emb2d)

    if not is_list:
        return out.reshape(shapes[0])
    outs, off = [], 0
    for s, r in zip(shapes, rows):
        outs.append(out[off:off + r].reshape(s))
        off += r
    return outs


def history_mapper(x, params, max_tile=512):
    """x: (B, L, H) -> (B, L, H).  Row tiles of up to 512 (multiples of 128 at
    production sizes fill the 256-wide MXUs on v6e/v7x and the 4x128 MXU on v5e);
    the two (768,768) bf16 weights stay resident across grid steps (~10 MB total
    VMEM at tile=512, safe under the 32 MiB scoped default everywhere incl. v7x)."""
    B, L, _ = x.shape
    R = B * L
    tile = R if R <= max_tile else max_tile
    n_sub = 4 if tile % 32 == 0 else (2 if tile % 16 == 0 else 1)

    x2d = x.reshape(R, HIDDEN)
    if x2d.dtype != jnp.bfloat16:
        x2d = x2d.astype(jnp.bfloat16)

    out = pl.pallas_call(
        functools.partial(_history_mapper_kernel, n_sub=n_sub),
        out_shape=jax.ShapeDtypeStruct((R, HIDDEN), jnp.bfloat16),
        grid=(pl.cdiv(R, tile),),
        in_specs=[
            pl.BlockSpec((tile, HIDDEN), lambda i: (i, 0)),       # activations (bf16)
            pl.BlockSpec((HIDDEN, HIDDEN), lambda i: (0, 0)),     # W1 (resident, bf16)
            pl.BlockSpec((1, HIDDEN), lambda i: (0, 0)),          # b1
            pl.BlockSpec((HIDDEN, HIDDEN), lambda i: (0, 0)),     # W2 (resident, bf16)
            pl.BlockSpec((1, HIDDEN), lambda i: (0, 0)),          # b2
        ],
        out_specs=pl.BlockSpec((tile, HIDDEN), lambda i: (i, 0)),
        compiler_params=pltpu.CompilerParams(dimension_semantics=("parallel",)),
        cost_estimate=pl.CostEstimate(
            flops=4 * int(R) * HIDDEN * HIDDEN,
            transcendentals=0,
            bytes_accessed=int(R) * HIDDEN * 4 + 2 * HIDDEN * HIDDEN * 2,
        ),
    )(x2d, params["hm_w1"], params["hm_b1"], params["hm_w2"], params["hm_b2"])
    return out.reshape(B, L, HIDDEN)


def visual_states(action_embeds, action_masks, txt_embeds, txt_masks):
    """action_embeds: (B, L, H), action_masks: (B, L-1) bool,
       txt_embeds: (B, T, H), txt_masks: (B, T) bool -> states (B, H) f32.

    Grid over the batch ("parallel" → megacore sharding, bounded VMEM, double-buffered
    DMA).  The last-valid txt-token index is computed outside and scalar-prefetched so
    only an 8-row slab of txt_embeds is DMA'd per batch element instead of (T, H)."""
    B, L, _ = action_embeds.shape
    T = txt_embeds.shape[1]

    # Full-length mask with a zeroed first column (avoids the act[:, 1:, :] sublane
    # slice); shaped (B, L, 1) so the block's last two dims equal the full array dims.
    am = jnp.concatenate(
        [jnp.zeros((B, 1), jnp.float32), action_masks.astype(jnp.float32)], axis=1
    ).reshape(B, L, 1)

    # Last valid txt token per row (torch's [-1] wrap-around when the mask is empty).
    idx = jnp.sum(txt_masks.astype(jnp.int32), axis=-1) - 1
    idx = jnp.where(idx < 0, idx + T, idx)

    W = 8 if T >= 8 else T   # txt rows DMA'd per batch element (sublane-aligned window)

    grid_spec = pltpu.PrefetchScalarGridSpec(
        num_scalar_prefetch=1,
        grid=(B,),
        in_specs=[
            pl.BlockSpec((1, L, HIDDEN), lambda b, idx: (b, 0, 0)),      # action embeds
            pl.BlockSpec((1, L, 1), lambda b, idx: (b, 0, 0)),           # mask weights
            pl.BlockSpec((1, W, HIDDEN), lambda b, idx: (b, idx[b] // W, 0)),  # txt slab
        ],
        out_specs=pl.BlockSpec((1, 1, HIDDEN), lambda b, idx: (b, 0, 0)),
    )
    out = pl.pallas_call(
        functools.partial(_states_kernel, txt_window=W),
        out_shape=jax.ShapeDtypeStruct((B, 1, HIDDEN), jnp.float32),
        grid_spec=grid_spec,
        compiler_params=pltpu.CompilerParams(dimension_semantics=("parallel",)),
    )(idx, action_embeds, am, txt_embeds)
    return out.reshape(B, HIDDEN)


# --------------------------------------------------------------------------- parameters

def init_params(key):
    ks = jax.random.split(key, 6)
    s = 0.02
    return {
        # position_encoder: nn.Linear(3, 768) + nn.LayerNorm(768)   (kept in f32)
        "pos_w": s * jax.random.normal(ks[0], (3, HIDDEN), jnp.float32),
        "pos_b": s * jax.random.normal(ks[1], (1, HIDDEN), jnp.float32),
        "ln_g": jnp.ones((1, HIDDEN), jnp.float32),
        "ln_b": jnp.zeros((1, HIDDEN), jnp.float32),
        # history_mapper: Linear(768,768) -> ReLU -> Linear(768,768)  (weights in bf16)
        "hm_w1": (s * jax.random.normal(ks[2], (HIDDEN, HIDDEN), jnp.float32)
                  ).astype(jnp.bfloat16),
        "hm_b1": s * jax.random.normal(ks[3], (1, HIDDEN), jnp.float32),
        "hm_w2": (s * jax.random.normal(ks[4], (HIDDEN, HIDDEN), jnp.float32)
                  ).astype(jnp.bfloat16),
        "hm_b2": s * jax.random.normal(ks[5], (1, HIDDEN), jnp.float32),
    }


# ------------------------------------------------------------------------ pure-JAX refs

def _ref_pos_add(position, embeds, p):
    x = position.reshape(-1, 3).astype(jnp.float32) @ p["pos_w"] + p["pos_b"][0]
    mu = jnp.mean(x, -1, keepdims=True)
    var = jnp.mean((x - mu) ** 2, -1, keepdims=True)
    ln = (x - mu) / jnp.sqrt(var + 1e-12) * p["ln_g"][0] + p["ln_b"][0]
    return (embeds.reshape(-1, HIDDEN).astype(jnp.float32) + ln).reshape(embeds.shape)


def _ref_history_mapper(x, p):
    xb = x.reshape(-1, HIDDEN).astype(jnp.bfloat16)
    h = jnp.dot(xb, p["hm_w1"], preferred_element_type=jnp.float32) + p["hm_b1"][0]
    h = jnp.maximum(h, 0.0).astype(jnp.bfloat16)
    y = jnp.dot(h, p["hm_w2"], preferred_element_type=jnp.float32) + p["hm_b2"][0]
    return y.reshape(x.shape)


def _ref_states(act, amask, txt, tmask):
    act = act.astype(jnp.float32)
    txt = txt.astype(jnp.float32)
    amf = amask.astype(jnp.float32)
    valid = jnp.sum(amf, -1, keepdims=True)
    hist_mean = jnp.sum(act[:, 1:] * amf[..., None], 1) / valid
    idx = jnp.sum(tmask.astype(jnp.int32), -1) - 1
    sel = txt[jnp.arange(txt.shape[0]), idx]
    return sel * hist_mean


# --------------------------------------------------------------------------------- main

if __name__ == "__main__":
    key = jax.random.PRNGKey(0)
    kp, k1, k2, k3, k4, k5, k6, k7 = jax.random.split(key, 8)

    params = init_params(kp)

    B, N_OB, L_ACT, T = 2, 8, 5, 8   # batch, ob candidates, action seq, txt len

    # Stand-ins for vln_bert outputs (the backbone is external; see TODO above).
    # Backbone activations stream in bf16; positions/masks keep their natural dtypes.
    ob_embeds = jax.random.normal(k1, (B, N_OB, HIDDEN), jnp.float32).astype(jnp.bfloat16)
    ob_position = jax.random.normal(k2, (B, N_OB, 3), jnp.float32)
    action_embeds = jax.random.normal(k3, (B, L_ACT, HIDDEN), jnp.float32).astype(jnp.bfloat16)
    txt_embeds = jax.random.normal(k4, (B, T, HIDDEN), jnp.float32).astype(jnp.bfloat16)
    action_masks = jnp.array([[1, 1, 1, 0], [1, 1, 0, 0]], jnp.bool_)       # (B, L_ACT-1)
    txt_masks = jnp.array([[1, 1, 1, 1, 1, 0, 0, 0],
                           [1, 1, 1, 0, 0, 0, 0, 0]], jnp.bool_)            # (B, T)
    hist_embeds = jax.random.normal(k5, (B, L_ACT, HIDDEN), jnp.float32).astype(jnp.bfloat16)
    position = jax.random.normal(k6, (B, 1, 3), jnp.float32)
    one_step_action_embeds = jax.random.normal(
        k7, (B, 1, HIDDEN), jnp.float32).astype(jnp.bfloat16)

    # mode == 'observation' (ob_embeds + position_encoder(ob_position)) and
    # mode == 'action' (action_embeds + position_encoder(position)) fused into one call.
    # (In the real model these are separate forward() calls; the tiny action call could
    #  alternatively bypass Pallas below ~64 rows.)
    ob_out, act_out = position_encoder_add(
        [ob_position, position], [ob_embeds, one_step_action_embeds], params)
    # history_mapper applied to history embeddings (used inside the 'visual' branch)
    hist_mapped = history_mapper(hist_embeds, params)
    # mode == 'visual' with return_states=True: pooled state vector
    states = visual_states(action_embeds, action_masks, txt_embeds, txt_masks)

    jax.block_until_ready((ob_out, act_out, hist_mapped, states))

    # correctness checks against pure-JAX references (kernel outputs are bf16 streams)
    assert jnp.allclose(ob_out.astype(jnp.float32),
                        _ref_pos_add(ob_position, ob_embeds, params), atol=5e-2)
    assert jnp.allclose(act_out.astype(jnp.float32),
                        _ref_pos_add(position, one_step_action_embeds, params), atol=5e-2)
    assert jnp.allclose(hist_mapped.astype(jnp.float32),
                        _ref_history_mapper(hist_embeds, params), atol=2e-2)
    assert jnp.allclose(states,
                        _ref_states(action_embeds, action_masks, txt_embeds, txt_masks),
                        atol=1e-2)

    print("KERNEL_OK")
</pallas_src>

<mosaic_0001>
module attributes {stable_mosaic.version = 11 : i64} {
  func.func @_pos_encoder_add_kernel(%arg0: i32, %arg1: memref<18x3xf32, #tpu.memory_space<vmem>>, %arg2: memref<3x768xf32, #tpu.memory_space<vmem>>, %arg3: memref<1x768xf32, #tpu.memory_space<vmem>>, %arg4: memref<1x768xf32, #tpu.memory_space<vmem>>, %arg5: memref<1x768xf32, #tpu.memory_space<vmem>>, %arg6: memref<18x768xbf16, #tpu.memory_space<vmem>>, %arg7: memref<18x768xbf16, #tpu.memory_space<vmem>>) attributes {dimension_semantics = [#tpu.dimension_semantics<parallel>], iteration_bounds = array<i64: 1>, scalar_prefetch = 0 : i64, scratch_operands = 0 : i64, tpu.core_type = #tpu.core_type<tc>, window_params = [{transform_indices = @transform_0, window_bounds = array<i64: 18, 3>}, {pipeline_mode = #tpu.pipeline_mode<synchronous>, transform_indices = @transform_1, window_bounds = array<i64: 3, 768>}, {pipeline_mode = #tpu.pipeline_mode<synchronous>, transform_indices = @transform_2, window_bounds = array<i64: 1, 768>}, {pipeline_mode = #tpu.pipeline_mode<synchronous>, transform_indices = @transform_3, window_bounds = array<i64: 1, 768>}, {pipeline_mode = #tpu.pipeline_mode<synchronous>, transform_indices = @transform_4, window_bounds = array<i64: 1, 768>}, {transform_indices = @transform_5, window_bounds = array<i64: 18, 768>}, {transform_indices = @transform_6, window_bounds = array<i64: 18, 768>}]} {
    %c0 = arith.constant 0 : index
    %c0_0 = arith.constant 0 : index
    %0 = vector.load %arg1[%c0, %c0_0] : memref<18x3xf32, #tpu.memory_space<vmem>>, vector<18x3xf32>
    %c0_1 = arith.constant 0 : index
    %c0_2 = arith.constant 0 : index
    %1 = vector.load %arg2[%c0_1, %c0_2] : memref<3x768xf32, #tpu.memory_space<vmem>>, vector<3x768xf32>
    %2 = vector.extract_strided_slice %0 {offsets = [0, 0], sizes = [18, 1], strides = [1, 1]} : vector<18x3xf32> to vector<18x1xf32>
    %3 = vector.extract_strided_slice %1 {offsets = [0, 0], sizes = [1, 768], strides = [1, 1]} : vector<3x768xf32> to vector<1x768xf32>
    %4 = vector.broadcast %2 : vector<18x1xf32> to vector<18x768xf32>
    %5 = vector.broadcast %3 : vector<1x768xf32> to vector<18x768xf32>
    %6 = arith.mulf %4, %5 : vector<18x768xf32>
    %7 = vector.extract_strided_slice %0 {offsets = [0, 1], sizes = [18, 1], strides = [1, 1]} : vector<18x3xf32> to vector<18x1xf32>
    %8 = vector.extract_strided_slice %1 {offsets = [1, 0], sizes = [1, 768], strides = [1, 1]} : vector<3x768xf32> to vector<1x768xf32>
    %9 = vector.broadcast %7 : vector<18x1xf32> to vector<18x768xf32>
    %10 = vector.broadcast %8 : vector<1x768xf32> to vector<18x768xf32>
    %11 = arith.mulf %9, %10 : vector<18x768xf32>
    %12 = arith.addf %6, %11 : vector<18x768xf32>
    %13 = vector.extract_strided_slice %0 {offsets = [0, 2], sizes = [18, 1], strides = [1, 1]} : vector<18x3xf32> to vector<18x1xf32>
    %14 = vector.extract_strided_slice %1 {offsets = [2, 0], sizes = [1, 768], strides = [1, 1]} : vector<3x768xf32> to vector<1x768xf32>
    %15 = vector.broadcast %13 : vector<18x1xf32> to vector<18x768xf32>
    %16 = vector.broadcast %14 : vector<1x768xf32> to vector<18x768xf32>
    %17 = arith.mulf %15, %16 : vector<18x768xf32>
    %18 = arith.addf %12, %17 : vector<18x768xf32>
    %c0_3 = arith.constant 0 : index
    %c0_4 = arith.constant 0 : index
    %19 = vector.load %arg3[%c0_3, %c0_4] : memref<1x768xf32, #tpu.memory_space<vmem>>, vector<1x768xf32>
    %20 = vector.broadcast %19 : vector<1x768xf32> to vector<18x768xf32>
    %21 = arith.addf %18, %20 : vector<18x768xf32>
    %cst = arith.constant dense<0.000000e+00> : vector<18xf32>
    %22 = vector.multi_reduction <add>, %21, %cst [1] : vector<18x768xf32> to vector<18xf32>
    %23 = vector.shape_cast %22 : vector<18xf32> to vector<18x1xf32>
    %cst_5 = arith.constant 7.680000e+02 : f32
    %24 = vector.broadcast %cst_5 : f32 to vector<18x1xf32>
    %25 = arith.divf %23, %24 : vector<18x1xf32>
    %26 = vector.broadcast %25 : vector<18x1xf32> to vector<18x768xf32>
    %27 = arith.subf %21, %26 : vector<18x768xf32>
    %28 = arith.mulf %27, %27 : vector<18x768xf32>
    %cst_6 = arith.constant dense<0.000000e+00> : vector<18xf32>
    %29 = vector.multi_reduction <add>, %28, %cst_6 [1] : vector<18x768xf32> to vector<18xf32>
    %30 = vector.shape_cast %29 : vector<18xf32> to vector<18x1xf32>
    %cst_7 = arith.constant 7.680000e+02 : f32
    %31 = vector.broadcast %cst_7 : f32 to vector<18x1xf32>
    %32 = arith.divf %30, %31 : vector<18x1xf32>
    %cst_8 = arith.constant 9.99999996E-13 : f32
    %33 = vector.broadcast %cst_8 : f32 to vector<18x1xf32>
    %34 = arith.addf %32, %33 : vector<18x1xf32>
    %35 = math.rsqrt %34 : vector<18x1xf32>
    %36 = vector.broadcast %35 : vector<18x1xf32> to vector<18x768xf32>
    %37 = arith.mulf %27, %36 : vector<18x768xf32>
    %c0_9 = arith.constant 0 : index
    %c0_10 = arith.constant 0 : index
    %38 = vector.load %arg4[%c0_9, %c0_10] : memref<1x768xf32, #tpu.memory_space<vmem>>, vector<1x768xf32>
    %39 = vector.broadcast %38 : vector<1x768xf32> to vector<18x768xf32>
    %40 = arith.mulf %37, %39 : vector<18x768xf32>
    %c0_11 = arith.constant 0 : index
    %c0_12 = arith.constant 0 : index
    %41 = vector.load %arg5[%c0_11, %c0_12] : memref<1x768xf32, #tpu.memory_space<vmem>>, vector<1x768xf32>
    %42 = vector.broadcast %41 : vector<1x768xf32> to vector<18x768xf32>
    %43 = arith.addf %40, %42 : vector<18x768xf32>
    %c0_13 = arith.constant 0 : index
    %c0_14 = arith.constant 0 : index
    %44 = vector.load %arg6[%c0_13, %c0_14] : memref<18x768xbf16, #tpu.memory_space<vmem>>, vector<18x768xbf16>
    %45 = arith.extf %44 : vector<18x768xbf16> to vector<18x768xf32>
    %46 = arith.addf %45, %43 : vector<18x768xf32>
    %47 = arith.truncf %46 : vector<18x768xf32> to vector<18x768xbf16>
    %c0_15 = arith.constant 0 : index
    %c0_16 = arith.constant 0 : index
    %48 = vector.load %arg7[%c0_15, %c0_16] : memref<18x768xbf16, #tpu.memory_space<vmem>>, vector<18x768xbf16>
    tpu.vector_store %arg7[%c0_15, %c0_16], %47 {strides = array<i32>} : memref<18x768xbf16, #tpu.memory_space<vmem>>, vector<18x768xbf16>,
    return
  }
  func.func @transform_0(%arg0: i32) -> (i32, i32) {
    %c0_i32 = arith.constant 0 : i32
    %c0_i32_0 = arith.constant 0 : i32
    return %arg0, %c0_i32 : i32, i32
  }
  func.func @transform_1(%arg0: i32) -> (i32, i32) {
    %c0_i32 = arith.constant 0 : i32
    %c0_i32_0 = arith.constant 0 : i32
    %c0_i32_1 = arith.constant 0 : i32
    return %c0_i32, %c0_i32_0 : i32, i32
  }
  func.func @transform_2(%arg0: i32) -> (i32, i32) {
    %c0_i32 = arith.constant 0 : i32
    %c0_i32_0 = arith.constant 0 : i32
    %c0_i32_1 = arith.constant 0 : i32
    return %c0_i32, %c0_i32_0 : i32, i32
  }
  func.func @transform_3(%arg0: i32) -> (i32, i32) {
    %c0_i32 = arith.constant 0 : i32
    %c0_i32_0 = arith.constant 0 : i32
    %c0_i32_1 = arith.constant 0 : i32
    return %c0_i32, %c0_i32_0 : i32, i32
  }
  func.func @transform_4(%arg0: i32) -> (i32, i32) {
    %c0_i32 = arith.constant 0 : i32
    %c0_i32_0 = arith.constant 0 : i32
    %c0_i32_1 = arith.constant 0 : i32
    return %c0_i32, %c0_i32_0 : i32, i32
  }
  func.func @transform_5(%arg0: i32) -> (i32, i32) {
    %c0_i32 = arith.constant 0 : i32
    %c0_i32_0 = arith.constant 0 : i32
    return %arg0, %c0_i32 : i32, i32
  }
  func.func @transform_6(%arg0: i32) -> (i32, i32) {
    %c0_i32 = arith.constant 0 : i32
    %c0_i32_0 = arith.constant 0 : i32
    return %arg0, %c0_i32 : i32, i32
  }
}

</mosaic_0001>

<bundles_post_ra>
// kernel: tpu_custom_call.1
= control target key start
LH: loop header
LB: loop body
LE: loop exit
PB: predicated region body
PF: predicated region fallthrough
CT: control target
= control target key end

     0   :  { %11 = vsyncpa [#allocation3], 0  ;;  %s1332_s0 = inlined_call_operand.vmem [shape: f32[18,3], index: 0, kind: input, shape index: {}]   ;;  %s1333_s1 = inlined_call_operand.vmem [shape: f32[3,768], index: 1, kind: input, shape index: {}]   ;;  %s1334_s2 = inlined_call_operand.vmem [shape: f32[1,768], index: 2, kind: input, shape index: {}]   ;;  %s1335_s3 = inlined_call_operand.vmem [shape: f32[1,768], index: 3, kind: input, shape index: {}]   ;;  %s1336_s4 = inlined_call_operand.vmem [shape: f32[1,768], index: 4, kind: input, shape index: {}]   ;;  %s1337_s5 = inlined_call_operand.hbm [shape: bf16[18,768], index: 5, kind: input, shape index: {}]   ;;  %s1338_s6 = inlined_call_operand.hbm [shape: bf16[18,768], index: 6, kind: output, shape index: {}]  }
   0x1   :  { %12 = vsyncpa [#allocation4], 0  ;;  %s826_s21 = smov [#allocation2]   ;;  %s778_s25 = scalar_lea.hbm %s1337_s5, 1152 }
   0x2   :  { %s28_s22 = sshll.u32 %s826_s21, 4  ;;  %p779_p0 = scmp.ne.s32.totalorder %s1337_s5, %s778_s25  ;;  %s29_s22 = int_to_ptr.vmem [resolvable:$true] %s28_s22 }
   0x3   :  { %p782_p1 = scmp.lt.u32.totalorder %s778_s25, %s1337_s5 }
   0x5   :  { %p784_p2 = pnand %p782_p1, %p779_p0 }
   0x7   :  { %787 = shalt.err (!%p784_p2)
}
   0x8   :  { %s788_s30 = scalar_lea.vmem %s29_s22, 1152  ;;  %p793_p4 = scmp.lt.s32.totalorder %s29_s22, %s29_s22 }
   0x9   :  { %p789_p3 = scmp.ne.s32.totalorder %s29_s22, %s788_s30  ;;  %p794_p5 = scmp.lt.s32.totalorder %s788_s30, %s788_s30 }
   0xb   :  { %p795_p6 = por %p794_p5, %p793_p4 }
   0xd   :  { %p796_p7 = pnand %p795_p6, %p789_p3 }
   0xf   :  { %799 = shalt.err (!%p796_p7)
}
  0x10   :  { %s827_s7 = smov 384   ;;  %s828_s8 = smov 24  }
  0x11   :  { %34 = dma.hbm_to_vmem [thread:$0]  %s1337_s5, 1152, %s29_s22, [#allocation3], %s827_s7, %s827_s7, %s828_s8  }
  0x12   :  { %822 = dma.done.wait [#allocation3], 1152  }
  0x13   :  { %823 = vsyncadd [#allocation3], 4294966144  ;;  %v829_v0 = vmov 0   ;;  %v40_v1 = vld [vmem:[%s1332_s0 + $0x10] sm:$0x3]  ;;  %v38_v2 = vld [vmem:[%s1332_s0] sm:$0xff]  ;;  %v62_v6 = vlaneseq }
  0x14   :  { %768 = vset.pattern.permute.xlu1 %v829_v0  ;;  %766 = vset.pattern.permute.xlu0 %v829_v0  ;;  %v39_v3 = vld [vmem:[%s1332_s0 + $0x8] sm:$0xff]  ;;  %v830_v4 = vmov 1   ;;  %v831_v5 = vmov 2   ;;  %v41_v10 = vld [vmem:[%s1333_s1] sm:$0x77]  ;;  %vm402_vm0 = vcmask 1041408  }
  0x15   :  { %56 = vperm.xlu0 %766, %v40_v1   ;;  %46 = vperm.xlu1 %768, %v38_v2   ;;  %v63_v7 = vshrl.u32 %v62_v6, 7  ;;  %v42_v11 = vld [vmem:[%s1333_s1 + $0x8] sm:$0x77]  ;;  %v43_v12 = vld [vmem:[%s1333_s1 + $0x10] sm:$0x77] }
  0x16   :  { %v338_v46 = vld [vmem:[%s1334_s2] sm:$0x3f] }
  0x17   :  { %v892_v8 = vsub.s32 0, %v63_v7  ;;  %v894_v9 = vsub.s32 4, %v63_v7  ;;  %v908_v16 = vsub.s32 1, %v63_v7  ;;  %v910_v17 = vsub.s32 5, %v63_v7 }
  0x18   :  { %v912_v18 = vsub.s32 2, %v63_v7  ;;  %v254_v19 = vsub.s32 6, %v63_v7  ;;  %v932_v41 = vsub.s32 3, %v63_v7 }
  0x19   :  { %767 = vset.pattern.permute.xlu0 %v830_v4  ;;  %51 = vperm.xlu1 %768, %v39_v3   ;;  %v65_v13 = vrot.slane %v41_v10, %v892_v8  ;;  %v69_v14 = vrot.slane %v41_v10, %v894_v9  ;;  %v73_v15 = vrot.slane %v42_v11, %v892_v8 }
  0x1a   :  { %143 = vperm.xlu0 %767, %v40_v1   ;;  %1341 = vst [vmem:[#allocation8_spill] sm:$0xff] %v910_v17  ;;  %v77_v20 = vrot.slane %v42_v11, %v894_v9  ;;  %v81_v21 = vrot.slane %v43_v12, %v892_v8  ;;  %v85_v25 = vrot.slane %v43_v12, %v894_v9 }
  0x1b   :  { %v95_v22 = vrot.slane %v65_v13, %v892_v8  ;;  %v99_v23 = vrot.slane %v69_v14, %v892_v8  ;;  %v103_v24 = vrot.slane %v73_v15, %v892_v8  ;;  %v149_v26 = vrot.slane %v41_v10, %v908_v16 }
  0x1c   :  { %v153_v27 = vrot.slane %v41_v10, %v910_v17  ;;  %v157_v28 = vrot.slane %v42_v11, %v908_v16  ;;  %v161_v29 = vrot.slane %v42_v11, %v910_v17  ;;  %v165_v30 = vrot.slane %v43_v12, %v908_v16 }
  0x1d   :  { %769 = vset.pattern.permute.xlu1 %v830_v4  ;;  %v251_v31 = vrot.slane %v41_v10, %v912_v18  ;;  %v255_v32 = vrot.slane %v41_v10, %v254_v19  ;;  %v169_v33 = vrot.slane %v43_v12, %v910_v17  ;;  %v259_v34 = vrot.slane %v42_v11, %v912_v18 }
  0x1e   :  { %139 = vperm.xlu0 %767, %v39_v3   ;;  %135 = vperm.xlu1 %769, %v38_v2   ;;  %v263_v35 = vrot.slane %v42_v11, %v254_v19  ;;  %v267_v36 = vrot.slane %v43_v12, %v912_v18  ;;  %v271_v37 = vrot.slane %v43_v12, %v254_v19 }
  0x1f   :  { %v107_v38 = vrot.slane %v77_v20, %v892_v8  ;;  %v111_v39 = vrot.slane %v81_v21, %v892_v8  ;;  %v115_v40 = vrot.slane %v85_v25, %v892_v8  ;;  %v179_v42 = vrot.slane %v149_v26, %v908_v16 }
  0x20   :  { %v183_v43 = vrot.slane %v153_v27, %v908_v16  ;;  %v187_v44 = vrot.slane %v157_v28, %v908_v16  ;;  %v191_v45 = vrot.slane %v161_v29, %v908_v16  ;;  %v942_v49 = vrot.slane %v165_v30, %v908_v16 }
  0x21   :  { %v945_v50 = vrot.slane %v251_v31, %v912_v18  ;;  %v948_v51 = vrot.slane %v255_v32, %v912_v18  ;;  %v951_v52 = vrot.slane %v169_v33, %v908_v16  ;;  %v954_v53 = vrot.slane %v259_v34, %v912_v18 }
  0x22   :  { %771 = vset.pattern.permute.xlu0 %v831_v5  ;;  %770 = vset.pattern.permute.xlu1 %v831_v5  ;;  %v957_v54 = vrot.slane %v263_v35, %v912_v18  ;;  %v960_v55 = vrot.slane %v267_v36, %v912_v18  ;;  %v963_v56 = vrot.slane %v271_v37, %v912_v18 }
  0x23   :  { %237 = vperm.xlu0 %771, %v38_v2   ;;  %245 = vperm.xlu1 %770, %v40_v1   ;;  %v966_v57 = vrot.slane %v338_v46, %v892_v8  ;;  %v969_v58 = vrot.slane %v338_v46, %v908_v16  ;;  %v972_v59 = vrot.slane %v338_v46, %v912_v18 }
  0x24   :  { %v975_v60 = vrot.slane %v338_v46, %v932_v41  ;;  %v978_v63 = vrot.slane %v338_v46, %v894_v9  ;;  %v981_v0 = vrot.slane %v338_v46, %v910_v17 }
  0x27   :  { %241 = vperm.xlu1 %770, %v39_v3  }
  0x94   :  { %v57_v47 = vpop.permute.xlu0 %56  ;;  %v47_v48 = vpop.permute.xlu1 %46 }
  0x95   :  { %v128_v61 = vmul.f32 %v95_v22, %v57_v47  ;;  %v129_v62 = vmul.f32 %v99_v23, %v57_v47  ;;  %v130_v1 = vmul.f32 %v103_v24, %v57_v47  ;;  %v131_v2 = vmul.f32 %v107_v38, %v57_v47 }
  0x96   :  { %v132_v3 = vmul.f32 %v111_v39, %v57_v47  ;;  %v116_v4 = vmul.f32 %v95_v22, %v47_v48  ;;  %v117_v6 = vmul.f32 %v99_v23, %v47_v48  ;;  %v118_v7 = vmul.f32 %v103_v24, %v47_v48 }
  0x97   :  { %v119_v10 = vmul.f32 %v107_v38, %v47_v48  ;;  %v120_v12 = vmul.f32 %v111_v39, %v47_v48  ;;  %v121_v25 = vmul.f32 %v115_v40, %v47_v48  ;;  %v133_v26 = vmul.f32 %v115_v40, %v57_v47 }
  0x98   :  { %v52_v5 = vpop.permute.xlu1 %51 }
  0x99   :  { %v144_v11 = vpop.permute.xlu0 %143  ;;  %v122_v20 = vmul.f32 %v95_v22, %v52_v5  ;;  %v123_v21 = vmul.f32 %v99_v23, %v52_v5  ;;  %v983_v27 = vmul.f32 %v103_v24, %v52_v5  ;;  %v985_v28 = vmul.f32 %v107_v38, %v52_v5 }
  0x9a   :  { %v212_v13 = vmul.f32 %v179_v42, %v144_v11  ;;  %v213_v14 = vmul.f32 %v183_v43, %v144_v11  ;;  %v214_v15 = vmul.f32 %v187_v44, %v144_v11  ;;  %v215_v19 = vmul.f32 %v191_v45, %v144_v11 }
  0x9b   :  { %v216_v29 = vmul.f32 %v942_v49, %v144_v11  ;;  %v217_v30 = vmul.f32 %v951_v52, %v144_v11  ;;  %v989_v35 = vmul.f32 %v111_v39, %v52_v5  ;;  %v991_v36 = vmul.f32 %v115_v40, %v52_v5 }
  0x9c   :  { %v230_v31 = vadd.f32 %v212_v13, %v128_v61  ;;  %v231_v32 = vadd.f32 %v213_v14, %v129_v62  ;;  %v232_v22 = vadd.f32 %v214_v15, %v130_v1  ;;  %v233_v46 = vadd.f32 %v215_v19, %v131_v2 }
  0x9d   :  { %v140_v33 = vpop.permute.xlu0 %139  ;;  %v136_v34 = vpop.permute.xlu1 %135  ;;  %v234_v61 = vadd.f32 %v216_v29, %v132_v3  ;;  %v235_v62 = vadd.f32 %v217_v30, %v133_v26 }
  0x9e   :  { %v206_v23 = vmul.f32 %v179_v42, %v140_v33  ;;  %v207_v37 = vmul.f32 %v183_v43, %v140_v33  ;;  %v200_v24 = vmul.f32 %v179_v42, %v136_v34  ;;  %v201_v47 = vmul.f32 %v183_v43, %v136_v34 }
  0x9f   :  { %v202_v38 = vmul.f32 %v187_v44, %v136_v34  ;;  %v203_v48 = vmul.f32 %v191_v45, %v136_v34  ;;  %v204_v17 = vmul.f32 %v942_v49, %v136_v34  ;;  %v205_v11 = vmul.f32 %v951_v52, %v136_v34 }
  0xa0   :  { %v995_v13 = vmul.f32 %v187_v44, %v140_v33  ;;  %v997_v39 = vmul.f32 %v191_v45, %v140_v33  ;;  %v999_v40 = vadd.f32 %v206_v23, %v122_v20  ;;  %v1001_v1 = vadd.f32 %v207_v37, %v123_v21 }
  0xa1   :  { %v218_v5 = vadd.f32 %v200_v24, %v116_v4  ;;  %v219_v2 = vadd.f32 %v201_v47, %v117_v6  ;;  %v220_v14 = vadd.f32 %v202_v38, %v118_v7  ;;  %v221_v15 = vadd.f32 %v203_v48, %v119_v10 }
  0xa2   :  { %v238_v42 = vpop.permute.xlu0 %237  ;;  %v246_v43 = vpop.permute.xlu1 %245  ;;  %v222_v26 = vadd.f32 %v204_v17, %v120_v12  ;;  %v223_v21 = vadd.f32 %v205_v11, %v121_v25  ;;  %v210_v29 = vmul.f32 %v942_v49, %v140_v33  ;;  %v211_v12 = vmul.f32 %v951_v52, %v140_v33 }
  0xa3   :  { %v302_v19 = vmul.f32 %v945_v50, %v238_v42  ;;  %v303_v3 = vmul.f32 %v948_v51, %v238_v42  ;;  %v304_v44 = vmul.f32 %v954_v53, %v238_v42  ;;  %v314_v45 = vmul.f32 %v945_v50, %v246_v43 }
  0xa4   :  { %v315_v20 = vmul.f32 %v948_v51, %v246_v43  ;;  %v305_v4 = vmul.f32 %v957_v54, %v238_v42  ;;  %v306_v6 = vmul.f32 %v960_v55, %v238_v42  ;;  %v307_v7 = vmul.f32 %v963_v56, %v238_v42 }
  0xa5   :  { %v320_v10 = vadd.f32 %v302_v19, %v218_v5  ;;  %v316_v30 = vmul.f32 %v954_v53, %v246_v43  ;;  %v317_v34 = vmul.f32 %v957_v54, %v246_v43  ;;  %v321_v37 = vadd.f32 %v303_v3, %v219_v2 }
  0xa6   :  { %v242_v23 = vpop.permute.xlu1 %241  ;;  %v322_v24 = vadd.f32 %v304_v44, %v220_v14  ;;  %v332_v47 = vadd.f32 %v314_v45, %v230_v31  ;;  %v333_v38 = vadd.f32 %v315_v20, %v231_v32  ;;  %v323_v17 = vadd.f32 %v305_v4, %v221_v15 }
  0xa7   :  { %v308_v25 = vmul.f32 %v945_v50, %v242_v23  ;;  %v309_v48 = vmul.f32 %v948_v51, %v242_v23  ;;  %v1018_v11 = vadd.f32 %v966_v57, %v320_v10  ;;  %v1021_v49 = vadd.f32 %v969_v58, %v321_v37 }
  0xa8   :  { %v324_v5 = vadd.f32 %v306_v6, %v222_v26  ;;  %v325_v42 = vadd.f32 %v307_v7, %v223_v21  ;;  %v318_v2 = vmul.f32 %v960_v55, %v246_v43  ;;  %v319_v31 = vmul.f32 %v963_v56, %v246_v43 }
  0xa9   :  { %v372_v32 = vadd.f32 %v972_v59, %v322_v24  ;;  %v388_v52 = vadd.f32 %v1021_v49, %v1018_v11  ;;  %v334_v50 = vadd.f32 %v316_v30, %v232_v22  ;;  %v335_v33 = vadd.f32 %v317_v34, %v233_v46 }
  0xaa   :  { %v336_v51 = vadd.f32 %v318_v2, %v234_v61  ;;  %v337_v14 = vadd.f32 %v319_v31, %v235_v62  ;;  %v1029_v15 = vadd.f32 %v966_v57, %v332_v47  ;;  %v1032_v19 = vadd.f32 %v969_v58, %v333_v38 }
  0xab   :  { %v373_v3 = vadd.f32 %v975_v60, %v323_v17  ;;  %v389_v44 = vadd.f32 %v388_v52, %v372_v32  ;;  %v1036_v43 = vadd.f32 %v972_v59, %v334_v50  ;;  %v1039_v45 = vadd.f32 %v975_v60, %v335_v33 }
  0xac   :  { %v310_v22 = vmul.f32 %v954_v53, %v242_v23  ;;  %v1043_v46 = vadd.f32 %v978_v63, %v336_v51  ;;  %v403_v61 = vsel %vm402_vm0, %v1029_v15, 0.0  ;;  %v404_v62 = vsel %vm402_vm0, %v1032_v19, 0.0 }
  0xad   :  { %v374_v20 = vadd.f32 %v978_v63, %v324_v5  ;;  %v375_v26 = vadd.f32 %v981_v0, %v325_v42  ;;  %v390_v21 = vadd.f32 %v389_v44, %v373_v3  ;;  %v405_v4 = vadd.f32 %v404_v62, %v403_v61 }
  0xae   :  { %v1052_v6 = vadd.f32 %v981_v0, %v337_v14  ;;  %v406_v53 = vsel %vm402_vm0, %v1036_v43, 0.0  ;;  %v408_v7 = vsel %vm402_vm0, %v1039_v45, 0.0  ;;  %v226_v10 = vadd.f32 %v995_v13, %v983_v27 }
  0xaf   :  { %v391_v30 = vadd.f32 %v390_v21, %v374_v20  ;;  %v407_v34 = vadd.f32 %v406_v53, %v405_v4  ;;  %v410_v37 = vsel %vm402_vm0, %v1043_v46, 0.0  ;;  %v311_v24 = vmul.f32 %v957_v54, %v242_v23 }
  0xb0   :  { %v227_v47 = vadd.f32 %v997_v39, %v985_v28  ;;  %v312_v38 = vmul.f32 %v960_v55, %v242_v23  ;;  %v326_v17 = vadd.f32 %v308_v25, %v999_v40  ;;  %v327_v5 = vadd.f32 %v309_v48, %v1001_v1 }
  0xb1   :  { %v392_v42 = vadd.f32 %v391_v30, %v375_v26  ;;  %v409_v2 = vadd.f32 %v408_v7, %v407_v34  ;;  %v228_v27 = vadd.f32 %v210_v29, %v989_v35  ;;  %v328_v13 = vadd.f32 %v310_v22, %v226_v10 }
  0xb2   :  { %v313_v31 = vmul.f32 %v963_v56, %v242_v23  ;;  %v329_v52 = vadd.f32 %v311_v24, %v227_v47  ;;  %v376_v50 = vadd.f32 %v966_v57, %v326_v17  ;;  %v377_v54 = vadd.f32 %v969_v58, %v327_v5 }
  0xb3   :  { %393 = vadd.xlane.f32.xlu0 %v392_v42  ;;  %v411_v28 = vadd.f32 %v410_v37, %v409_v2  ;;  %v412_v55 = vsel %vm402_vm0, %v1052_v6, 0.0  ;;  %v229_v39 = vadd.f32 %v211_v12, %v991_v36  ;;  %v330_v40 = vadd.f32 %v312_v38, %v228_v27 }
  0xb4   :  { %v378_v1 = vadd.f32 %v972_v59, %v328_v13  ;;  %v395_v25 = vadd.f32 %v377_v54, %v376_v50  ;;  %v379_v56 = vadd.f32 %v975_v60, %v329_v52 }
  0xb5   :  { %v413_v35 = vadd.f32 %v412_v55, %v411_v28  ;;  %v331_v29 = vadd.f32 %v313_v31, %v229_v39  ;;  %v380_v57 = vadd.f32 %v978_v63, %v330_v40 }
  0xb6   :  { %v396_v23 = vadd.f32 %v395_v25, %v378_v1 }
  0xb7   :  { %414 = vadd.xlane.f32.xlu1 %v413_v35  ;;  %v381_v48 = vadd.f32 %v981_v0, %v331_v29 }
  0xb8   :  { %v397_v58 = vadd.f32 %v396_v23, %v379_v56 }
  0xba   :  { %v398_v33 = vadd.f32 %v397_v58, %v380_v57 }
  0xbc   :  { %v399_v51 = vadd.f32 %v398_v33, %v381_v48 }
  0xbe   :  { %400 = vadd.xlane.f32.xlu0 %v399_v51 }
 0x140   :  { %v394_v14 = vpop.xlane.xlu0 %393 }
 0x141   :  { %v417_v36 = vmul.f32 0.0013020834, %v394_v14 }
 0x143   :  { %v1080_v12 = vsub.f32 %v1018_v11, %v417_v36  ;;  %v1083_v59 = vsub.f32 %v1021_v49, %v417_v36  ;;  %v1085_v44 = vsub.f32 %v372_v32, %v417_v36  ;;  %v1087_v22 = vsub.f32 %v373_v3, %v417_v36 }
 0x144   :  { %v415_v60 = vpop.xlane.xlu1 %414  ;;  %v1093_v62 = vsub.f32 %v374_v20, %v417_v36  ;;  %v1106_v4 = vsub.f32 %v375_v26, %v417_v36 }
 0x145   :  { %v419_v63 = vmul.f32 0.0013020834, %v415_v60  ;;  %v438_v0 = vmul.f32 %v1080_v12, %v1080_v12  ;;  %v439_v61 = vmul.f32 %v1083_v59, %v1083_v59  ;;  %v440_v11 = vmul.f32 %v1085_v44, %v1085_v44 }
 0x146   :  { %v441_v53 = vmul.f32 %v1087_v22, %v1087_v22  ;;  %v443_v17 = vmul.f32 %v1106_v4, %v1106_v4 }
 0x147   :  { %v456_v21 = vadd.f32 %v439_v61, %v438_v0  ;;  %v1098_v49 = vsub.f32 %v1029_v15, %v419_v63  ;;  %v1101_v32 = vsub.f32 %v1032_v19, %v419_v63  ;;  %v1104_v3 = vsub.f32 %v1036_v43, %v419_v63 }
 0x148   :  { %v1111_v20 = vsub.f32 %v1039_v45, %v419_v63  ;;  %v1114_v10 = vsub.f32 %v1043_v46, %v419_v63  ;;  %v442_v43 = vmul.f32 %v1093_v62, %v1093_v62  ;;  %v1125_v45 = vsub.f32 %v1052_v6, %v419_v63 }
 0x149   :  { %v457_v7 = vadd.f32 %v456_v21, %v440_v11  ;;  %v450_v15 = vmul.f32 %v1098_v49, %v1098_v49  ;;  %v451_v19 = vmul.f32 %v1101_v32, %v1101_v32  ;;  %v452_v26 = vmul.f32 %v1104_v3, %v1104_v3  ;;  %v510_v21 = vld [vmem:[%s1335_s3] sm:$0x3f]  ;;  %s832_s3 = smov [#allocation5]  }
 0x14a   :  { %v453_v47 = vmul.f32 %v1111_v20, %v1111_v20  ;;  %v454_v42 = vmul.f32 %v1114_v10, %v1114_v10  ;;  %v455_v52 = vmul.f32 %v1125_v45, %v1125_v45 }
 0x14b   :  { %v401_v30 = vpop.xlane.xlu0 %400  ;;  %v458_v34 = vadd.f32 %v457_v7, %v441_v53  ;;  %v470_v46 = vsel %vm402_vm0, %v450_v15, 0.0  ;;  %v471_v37 = vsel %vm402_vm0, %v451_v19, 0.0  ;;  %v473_v13 = vsel %vm402_vm0, %v452_v26, 0.0  ;;  %v560_v7 = vld [vmem:[%s1336_s4] sm:$0x3f]  ;;  %s729_s4 = sshll.u32 %s832_s3, 4  ;;  %s730_s4 = int_to_ptr.vmem [resolvable:$true] %s729_s4 }
 0x14c   :  { %v418_v24 = vmul.f32 0.0013020834, %v401_v30  ;;  %v472_v38 = vadd.f32 %v471_v37, %v470_v46  ;;  %v477_v29 = vsel %vm402_vm0, %v454_v42, 0.0  ;;  %v479_v51 = vsel %vm402_vm0, %v455_v52, 0.0  ;;  %v1183_v46 = vld [vmem:[#allocation2] sm:$0xff]  ;;  %v1199_v42 = vld [vmem:[#allocation2 + $0x10] sm:$0xff]  ;;  %p805_p9 = scmp.lt.s32.totalorder %s730_s4, %s730_s4 }
 0x14d   :  { %v459_v5 = vadd.f32 %v458_v34, %v442_v43  ;;  %v1172_v19 = vrot.slane %v510_v21, %v892_v8  ;;  %v1175_v43 = vrot.slane %v510_v21, %v908_v16  ;;  %v1178_v26 = vrot.slane %v510_v21, %v912_v18  ;;  %s800_s25 = scalar_lea.vmem %s730_s4, 1152 }
 0x14e   :  { %v1135_v2 = vsub.f32 %v376_v50, %v418_v24  ;;  %v1137_v6 = vsub.f32 %v377_v54, %v418_v24  ;;  %v1139_v27 = vsub.f32 %v378_v1, %v418_v24  ;;  %v474_v28 = vadd.f32 %v473_v13, %v472_v38  ;;  %p801_p8 = scmp.ne.s32.totalorder %s730_s4, %s800_s25  ;;  %p806_p10 = scmp.lt.s32.totalorder %s800_s25, %s800_s25 }
 0x14f   :  { %v460_v31 = vadd.f32 %v459_v5, %v443_v17  ;;  %v1144_v55 = vsub.f32 %v379_v56, %v418_v24  ;;  %v475_v54 = vsel %vm402_vm0, %v453_v47, 0.0  ;;  %v1151_v1 = vsub.f32 %v380_v57, %v418_v24  ;;  %v1197_v5 = vld [vmem:[#allocation2 + $0x8] sm:$0xff] }
 0x150   :  { %v444_v39 = vmul.f32 %v1135_v2, %v1135_v2  ;;  %v445_v50 = vmul.f32 %v1137_v6, %v1137_v6  ;;  %v476_v40 = vadd.f32 %v475_v54, %v474_v28  ;;  %v446_v25 = vmul.f32 %v1139_v27, %v1139_v27  ;;  %v1217_v54 = vld [vmem:[#allocation2 + $0x28] sm:$0xff]  ;;  %p807_p11 = por %p806_p10, %p805_p9 }
 0x151   :  { %461 = vadd.xlane.f32.xlu1 %v460_v31  ;;  %v1156_v23 = vsub.f32 %v381_v48, %v418_v24  ;;  %v447_v58 = vmul.f32 %v1144_v55, %v1144_v55  ;;  %v448_v57 = vmul.f32 %v1151_v1, %v1151_v1  ;;  %v1181_v30 = vrot.slane %v510_v21, %v932_v41  ;;  %v1342_v24 = vld [vmem:[#allocation8_spill] sm:$0xff] }
 0x152   :  { %v463_v35 = vadd.f32 %v445_v50, %v444_v39  ;;  %v478_v56 = vadd.f32 %v477_v29, %v476_v40  ;;  %v1186_v37 = vrot.slane %v510_v21, %v894_v9  ;;  %v1189_v47 = vrot.slane %v510_v21, %v1342_v24  ;;  %v1212_v39 = vld [vmem:[#allocation2 + $0x20] sm:$0xff]  ;;  %p808_p12 = pnand %p807_p11, %p801_p8 }
 0x153   :  { %v449_v60 = vmul.f32 %v1156_v23, %v1156_v23  ;;  %v1192_v38 = vrot.slane %v560_v7, %v892_v8  ;;  %v1195_v17 = vrot.slane %v560_v7, %v908_v16  ;;  %v1202_v13 = vrot.slane %v560_v7, %v912_v18  ;;  %v1210_v8 = vld [vmem:[#allocation2 + $0x18] sm:$0xff]  ;;  %v1219_v18 = vld [vmem:[#allocation2 + $0x30] sm:$0x11] }
 0x154   :  { %v464_v33 = vadd.f32 %v463_v35, %v446_v25  ;;  %v480_v14 = vadd.f32 %v479_v51, %v478_v56  ;;  %v1205_v31 = vrot.slane %v560_v7, %v932_v41  ;;  %v1208_v52 = vrot.slane %v560_v7, %v894_v9 }
 0x155   :  { %v1215_v16 = vrot.slane %v560_v7, %v1342_v24  ;;  %v619_v41 = vunpack.c.l.bf16 %v1183_v46  ;;  %v620_v40 = vunpack.c.h.bf16 %v1183_v46  ;;  %v621_v9 = vunpack.c.l.bf16 %v1197_v5 }
 0x156   :  { %v465_v36 = vadd.f32 %v464_v33, %v447_v58  ;;  %481 = vadd.xlane.f32.xlu1 %v480_v14  ;;  %v622_v25 = vunpack.c.h.bf16 %v1197_v5  ;;  %v623_v35 = vunpack.c.l.bf16 %v1199_v42  ;;  %v624_v29 = vunpack.c.h.bf16 %v1199_v42 }
 0x157   :  { %v625_v58 = vunpack.c.l.bf16 %v1210_v8  ;;  %v626_v33 = vunpack.c.h.bf16 %v1210_v8  ;;  %v627_v51 = vunpack.c.l.bf16 %v1212_v39 }
 0x158   :  { %v466_v63 = vadd.f32 %v465_v36, %v448_v57  ;;  %v1230_v57 = vld [vmem:[#allocation2 + $0x38] sm:$0x11] }
 0x15a   :  { %v467_v0 = vadd.f32 %v466_v63, %v449_v60 }
 0x15c   :  { %468 = vadd.xlane.f32.xlu0 %v467_v0  ;;  %v631_v0 = vunpack.c.l.bf16 %v1219_v18 }
 0x1de   :  { %v462_v48 = vpop.xlane.xlu1 %461 }
 0x1df   :  { %v483_v61 = vmul.f32 0.0013020834, %v462_v48 }
 0x1e1   :  { %v486_v11 = vadd.f32 1e-12, %v483_v61 }
 0x1e3   :  { %772 = vrsqrt.f32 %v486_v11  ;;  %v482_v53 = vpop.xlane.xlu1 %481 }
 0x1e4   :  { %v485_v15 = vmul.f32 0.0013020834, %v482_v53 }
 0x1e6   :  { %v488_v34 = vadd.f32 1e-12, %v485_v15  ;;  %v1242_v15 = vld [vmem:[#allocation2 + $0x40] sm:$0x11] }
 0x1e8   :  { %774 = vrsqrt.f32 %v488_v34  ;;  %v632_v34 = vunpack.c.h.bf16 %v1219_v18 }
 0x1e9   :  { %v469_v28 = vpop.xlane.xlu0 %468 }
 0x1ea   :  { %v484_v50 = vmul.f32 0.0013020834, %v469_v28 }
 0x1ec   :  { %v487_v56 = vadd.f32 1e-12, %v484_v50  ;;  %v635_v50 = vunpack.c.l.bf16 %v1242_v15 }
 0x1ed   :  { %v773_v14 = vpop.eup %772 }
 0x1ee   :  { %776 = vrsqrt.f32 %v487_v56  ;;  %v492_v48 = vmul.f32 %v773_v14, %v1080_v12  ;;  %v493_v61 = vmul.f32 %v773_v14, %v1083_v59  ;;  %v494_v11 = vmul.f32 %v773_v14, %v1085_v44 }
 0x1ef   :  { %v495_v21 = vmul.f32 %v773_v14, %v1087_v22  ;;  %v496_v53 = vmul.f32 %v773_v14, %v1093_v62  ;;  %v497_v7 = vmul.f32 %v773_v14, %v1106_v4  ;;  %v634_v4 = vunpack.c.h.bf16 %v1230_v57 }
 0x1f0   :  { %v542_v46 = vmul.f32 %v1172_v19, %v492_v48  ;;  %v543_v24 = vmul.f32 %v1175_v43, %v493_v61  ;;  %v544_v12 = vmul.f32 %v1178_v26, %v494_v11  ;;  %v636_v56 = vunpack.c.h.bf16 %v1242_v15 }
 0x1f1   :  { %v545_v44 = vmul.f32 %v1181_v30, %v495_v21  ;;  %v546_v22 = vmul.f32 %v1186_v37, %v496_v53  ;;  %v547_v62 = vmul.f32 %v1189_v47, %v497_v7 }
 0x1f2   :  { %v592_v5 = vadd.f32 %v1192_v38, %v542_v46  ;;  %v593_v28 = vadd.f32 %v1195_v17, %v543_v24  ;;  %v775_v14 = vpop.eup %774  ;;  %v594_v48 = vadd.f32 %v1202_v13, %v544_v12 }
 0x1f3   :  { %v595_v61 = vadd.f32 %v1205_v31, %v545_v44  ;;  %v596_v11 = vadd.f32 %v1208_v52, %v546_v22  ;;  %v597_v21 = vadd.f32 %v1215_v16, %v547_v62  ;;  %v504_v53 = vmul.f32 %v775_v14, %v1098_v49 }
 0x1f4   :  { %v505_v7 = vmul.f32 %v775_v14, %v1101_v32  ;;  %v506_v46 = vmul.f32 %v775_v14, %v1104_v3  ;;  %v507_v24 = vmul.f32 %v775_v14, %v1111_v20  ;;  %v508_v59 = vmul.f32 %v775_v14, %v1114_v10 }
 0x1f5   :  { %v509_v15 = vmul.f32 %v775_v14, %v1125_v45  ;;  %v637_v63 = vadd.f32 %v619_v41, %v592_v5  ;;  %v638_v12 = vadd.f32 %v620_v40, %v593_v28  ;;  %v554_v44 = vmul.f32 %v1172_v19, %v504_v53 }
 0x1f6   :  { %v555_v22 = vmul.f32 %v1175_v43, %v505_v7  ;;  %v556_v62 = vmul.f32 %v1178_v26, %v506_v46  ;;  %v557_v49 = vmul.f32 %v1181_v30, %v507_v24  ;;  %v558_v32 = vmul.f32 %v1186_v37, %v508_v59 }
 0x1f7   :  { %v559_v3 = vmul.f32 %v1189_v47, %v509_v15  ;;  %v639_v60 = vadd.f32 %v621_v9, %v594_v48  ;;  %v640_v20 = vadd.f32 %v622_v25, %v595_v61  ;;  %v604_v10 = vadd.f32 %v1192_v38, %v554_v44 }
 0x1f8   :  { %v777_v36 = vpop.eup %776  ;;  %v605_v45 = vadd.f32 %v1195_v17, %v555_v22  ;;  %v606_v41 = vadd.f32 %v1202_v13, %v556_v62  ;;  %v607_v40 = vadd.f32 %v1205_v31, %v557_v49  ;;  %v608_v48 = vadd.f32 %v1208_v52, %v558_v32 }
 0x1f9   :  { %v498_v5 = vmul.f32 %v777_v36, %v1135_v2  ;;  %v499_v28 = vmul.f32 %v777_v36, %v1137_v6  ;;  %v500_v14 = vmul.f32 %v777_v36, %v1139_v27  ;;  %v501_v59 = vmul.f32 %v777_v36, %v1144_v55 }
 0x1fa   :  { %v502_v9 = vmul.f32 %v777_v36, %v1151_v1  ;;  %v503_v25 = vmul.f32 %v777_v36, %v1156_v23  ;;  %v609_v61 = vadd.f32 %v1215_v16, %v559_v3  ;;  %v641_v1 = vadd.f32 %v623_v35, %v596_v11 }
 0x1fb   :  { %v548_v53 = vmul.f32 %v1172_v19, %v498_v5  ;;  %v549_v7 = vmul.f32 %v1175_v43, %v499_v28  ;;  %v550_v2 = vmul.f32 %v1178_v26, %v500_v14  ;;  %v551_v6 = vmul.f32 %v1181_v30, %v501_v59 }
 0x1fc   :  { %v552_v27 = vmul.f32 %v1186_v37, %v502_v9  ;;  %v553_v55 = vmul.f32 %v1189_v47, %v503_v25  ;;  %v642_v23 = vadd.f32 %v624_v29, %v597_v21  ;;  %v649_v47 = vadd.f32 %v631_v0, %v604_v10 }
 0x1fd   :  { %v598_v36 = vadd.f32 %v1192_v38, %v548_v53  ;;  %v599_v19 = vadd.f32 %v1195_v17, %v549_v7  ;;  %v600_v43 = vadd.f32 %v1202_v13, %v550_v2  ;;  %v601_v26 = vadd.f32 %v1205_v31, %v551_v6 }
 0x1fe   :  { %v602_v30 = vadd.f32 %v1208_v52, %v552_v27  ;;  %v603_v37 = vadd.f32 %v1215_v16, %v553_v55  ;;  %v650_v46 = vadd.f32 %v632_v34, %v605_v45  ;;  %v1343_v13 = vunpack.c.h.bf16 %v1212_v39 }
 0x1ff   :  { %v643_v42 = vadd.f32 %v625_v58, %v598_v36  ;;  %v644_v38 = vadd.f32 %v626_v33, %v599_v19  ;;  %v645_v17 = vadd.f32 %v627_v51, %v600_v43  ;;  %v1344_v52 = vunpack.c.l.bf16 %v1217_v54 }
 0x200   :  { %v646_v31 = vadd.f32 %v1343_v13, %v601_v26  ;;  %v1345_v16 = vunpack.c.h.bf16 %v1217_v54  ;;  %v1346_v29 = vunpack.c.l.bf16 %v1230_v57  ;;  %v652_v34 = vadd.f32 %v634_v4, %v607_v40 }
 0x201   :  { %v647_v35 = vadd.f32 %v1344_v52, %v602_v30  ;;  %v653_v8 = vadd.f32 %v635_v50, %v608_v48  ;;  %v654_v58 = vadd.f32 %v636_v56, %v609_v61  ;;  %v750_v33 = vpack.c.bf16 %v638_v12, %v637_v63 }
 0x202   :  { %v648_v18 = vadd.f32 %v1345_v16, %v603_v37  ;;  %v651_v0 = vadd.f32 %v1346_v29, %v606_v41  ;;  %v751_v11 = vpack.c.bf16 %v640_v20, %v639_v60  ;;  %v752_v51 = vpack.c.bf16 %v642_v23, %v641_v1 }
 0x203   :  { %v753_v21 = vpack.c.bf16 %v644_v38, %v643_v42  ;;  %v754_v39 = vpack.c.bf16 %v646_v31, %v645_v17  ;;  %v756_v15 = vpack.c.bf16 %v650_v46, %v649_v47  ;;  %v758_v22 = vpack.c.bf16 %v654_v58, %v653_v8  ;;  %715 = vst [vmem:[#allocation5] sm:$0xff] %v750_v33 }
 0x204   :  { %v755_v24 = vpack.c.bf16 %v648_v18, %v647_v35  ;;  %v757_v44 = vpack.c.bf16 %v652_v34, %v651_v0  ;;  %716 = vst [vmem:[#allocation5 + $0x8] sm:$0xff] %v751_v11  ;;  %717 = vst [vmem:[#allocation5 + $0x10] sm:$0xff] %v752_v51 }
 0x205   :  { %718 = vst [vmem:[#allocation5 + $0x18] sm:$0xff] %v753_v21  ;;  %719 = vst [vmem:[#allocation5 + $0x20] sm:$0xff] %v754_v39 }
 0x206   :  { %720 = vst [vmem:[#allocation5 + $0x28] sm:$0xff] %v755_v24  ;;  %721 = vst [vmem:[#allocation5 + $0x30] sm:$0x11] %v756_v15 }
 0x207   :  { %722 = vst [vmem:[#allocation5 + $0x38] sm:$0x11] %v757_v44  ;;  %723 = vst [vmem:[#allocation5 + $0x40] sm:$0x11] %v758_v22 }
 0x208   :  { %811 = shalt.err (!%p808_p12)
}
 0x209   :  { %s812_s28 = scalar_lea.hbm %s1338_s6, 1152 }
 0x20a   :  { %p813_p13 = scmp.ne.s32.totalorder %s1338_s6, %s812_s28  ;;  %p816_p0 = scmp.lt.u32.totalorder %s812_s28, %s1338_s6 }
 0x20c   :  { %p818_p1 = pnand %p816_p0, %p813_p13 }
 0x20e   :  { %821 = shalt.err (!%p818_p1)
}
 0x20f   :  { %735 = dma.vmem_to_hbm [thread:$0]  %s730_s4, 1152, %s1338_s6, [#allocation4], %s827_s7, %s827_s7, %s828_s8  }
 0x210   :  { %824 = dma.done.wait [#allocation4], 1152  }
 0x211   :  { %825 = vsyncadd [#allocation4], 4294966144 }
 0x212   :  { %739 = vsyncpa [#allocation3], 1 }
 0x213   :  { %740 = vsyncpa [#allocation4], 1 }

</bundles_post_ra>
